<compile_context>
chip_gen: v7x
topology: tpu7x:2x2x1
jax: 0.10.0
libtpu: 0.0.40
codegen_flags: <defaults>
</compile_context>

<pallas_src>
import jax
import jax.numpy as jnp
from jax import lax
from jax.experimental import pallas as pl
from jax.experimental.pallas import tpu as pltpu


def _round_up(v, m):
    return ((v + m - 1) // m) * m


def _pick_tile(n, candidates=(256, 128, 64, 32, 16, 8)):
    """Largest candidate tile that divides n (falls back to the full extent)."""
    for t in candidates:
        if n % t == 0:
            return t
    return n  # full extent is always legal per the (8,128) rule


# --------------------------------------------------------------------------
# Kernel 1: q / k / v projections (the three 1x1 convs).
# --------------------------------------------------------------------------
def _proj_kernel(x_ref, wq_ref, bq_ref, wk_ref, bk_ref, wv_ref, bv_ref,
                 q_ref, k_ref, v_ref):
    # x_ref block: (1, tn, Cp) f32 -> bf16 for the MXU, accumulate in f32.
    x = x_ref[0].astype(jnp.bfloat16)
    q = jnp.dot(x, wq_ref[...], preferred_element_type=jnp.float32) + bq_ref[...]
    k = jnp.dot(x, wk_ref[...], preferred_element_type=jnp.float32) + bk_ref[...]
    v = jnp.dot(x, wv_ref[...], preferred_element_type=jnp.float32) + bv_ref[...]
    q_ref[0] = q.astype(q_ref.dtype)
    k_ref[0] = k.astype(k_ref.dtype)
    v_ref[0] = v.astype(v_ref.dtype)


# --------------------------------------------------------------------------
# Kernel 2: flash attention (online softmax over KV tiles) + gamma residual.
# --------------------------------------------------------------------------
def _flash_kernel(gamma_ref, q_ref, k_ref, v_ref, x_ref, o_ref,
                  m_sc, l_sc, acc_sc):
    ki = pl.program_id(2)

    @pl.when(ki == 0)
    def _():
        m_sc[...] = jnp.full_like(m_sc, -jnp.inf)
        l_sc[...] = jnp.zeros_like(l_sc)
        acc_sc[...] = jnp.zeros_like(acc_sc)

    # energy[i, j] = q_i . k_j  -- contraction on the last axis, no transpose.
    s = lax.dot_general(q_ref[0], k_ref[0],
                        dimension_numbers=(((1,), (1,)), ((), ())),
                        preferred_element_type=jnp.float32)        # (tq, tk) f32

    m_prev = m_sc[...]
    m_new = jnp.maximum(m_prev, jnp.max(s, axis=-1, keepdims=True))
    alpha = jnp.exp(m_prev - m_new)
    p = jnp.exp(s - m_new)                                         # (tq, tk) f32
    l_sc[...] = alpha * l_sc[...] + jnp.sum(p, axis=-1, keepdims=True)
    acc_sc[...] = alpha * acc_sc[...] + jnp.dot(
        p.astype(v_ref.dtype), v_ref[0], preferred_element_type=jnp.float32)
    m_sc[...] = m_new

    @pl.when(ki == pl.num_programs(2) - 1)
    def _():
        attn_out = acc_sc[...] * pl.reciprocal(l_sc[...], approx=True)
        o_ref[0] = (gamma_ref[0] * attn_out
                    + x_ref[0].astype(jnp.float32)).astype(o_ref.dtype)


# --------------------------------------------------------------------------
# Wrapper: NCHW module forward.
# --------------------------------------------------------------------------
def pam_module_pallas(x_nchw, wq, bq, wk, bk, wv, bv, gamma):
    """x_nchw: (B, C, H, W); wq/wk: (Cq, C); wv: (C, C); biases 1-D; gamma: (1,)."""
    B, C, H, W = x_nchw.shape
    N = H * W
    Cq = wq.shape[0]
    Cp = _round_up(C, 128)      # lane-dense channel dim
    Cqp = _round_up(Cq, 128)    # full-width MXU contraction for the energy matmul

    tn = _pick_tile(N)          # projection spatial tile
    tq = _pick_tile(N)          # query tile
    tk = _pick_tile(N)          # key/value tile

    f32, bf16 = jnp.float32, jnp.bfloat16

    # ---- glue: NCHW -> (B, N, Cp) channels-last with zero channel padding ----
    # TODO(synk): these NCHW<->channels-last transposes are still plain XLA ops;
    # they could be folded into the kernels by keeping N on the lane axis.
    x_bnc = jnp.transpose(x_nchw.reshape(B, C, N), (0, 2, 1))
    x_pad = jnp.pad(x_bnc, ((0, 0), (0, 0), (0, Cp - C)))

    # Zero-pad weights/biases (exact: padded cols/rows contribute nothing).
    wq_p = jnp.pad(wq.T, ((0, Cp - C), (0, Cqp - Cq))).astype(bf16)   # (Cp, Cqp)
    wk_p = jnp.pad(wk.T, ((0, Cp - C), (0, Cqp - Cq))).astype(bf16)   # (Cp, Cqp)
    wv_p = jnp.pad(wv.T, ((0, Cp - C), (0, Cp - C))).astype(bf16)     # (Cp, Cp)
    bq_p = jnp.pad(bq, (0, Cqp - Cq)).reshape(1, Cqp).astype(f32)
    bk_p = jnp.pad(bk, (0, Cqp - Cq)).reshape(1, Cqp).astype(f32)
    bv_p = jnp.pad(bv, (0, Cp - C)).reshape(1, Cp).astype(f32)
    gamma1 = jnp.reshape(gamma, (1,)).astype(f32)

    # ---- kernel 1: q / k / v projections ----
    q_all, k_all, v_all = pl.pallas_call(
        _proj_kernel,
        out_shape=(jax.ShapeDtypeStruct((B, N, Cqp), bf16),
                   jax.ShapeDtypeStruct((B, N, Cqp), bf16),
                   jax.ShapeDtypeStruct((B, N, Cp), bf16)),
        grid_spec=pltpu.PrefetchScalarGridSpec(
            num_scalar_prefetch=0,
            grid=(B, N // tn),
            in_specs=[
                pl.BlockSpec((1, tn, Cp), lambda b, i: (b, i, 0)),
                pl.BlockSpec((Cp, Cqp), lambda b, i: (0, 0)),
                pl.BlockSpec((1, Cqp), lambda b, i: (0, 0)),
                pl.BlockSpec((Cp, Cqp), lambda b, i: (0, 0)),
                pl.BlockSpec((1, Cqp), lambda b, i: (0, 0)),
                pl.BlockSpec((Cp, Cp), lambda b, i: (0, 0)),
                pl.BlockSpec((1, Cp), lambda b, i: (0, 0)),
            ],
            out_specs=(
                pl.BlockSpec((1, tn, Cqp), lambda b, i: (b, i, 0)),
                pl.BlockSpec((1, tn, Cqp), lambda b, i: (b, i, 0)),
                pl.BlockSpec((1, tn, Cp), lambda b, i: (b, i, 0)),
            ),
        ),
        compiler_params=pltpu.CompilerParams(
            dimension_semantics=("parallel", "parallel"),
            vmem_limit_bytes=32 * 1024 * 1024),
    )(x_pad, wq_p, bq_p, wk_p, bk_p, wv_p, bv_p)

    # ---- kernel 2: flash attention + residual ----
    out_pad = pl.pallas_call(
        _flash_kernel,
        out_shape=jax.ShapeDtypeStruct((B, N, Cp), x_nchw.dtype),
        grid_spec=pltpu.PrefetchScalarGridSpec(
            num_scalar_prefetch=0,
            grid=(B, N // tq, N // tk),
            in_specs=[
                pl.BlockSpec(memory_space=pltpu.MemorySpace.SMEM),          # gamma
                pl.BlockSpec((1, tq, Cqp), lambda b, qi, ki: (b, qi, 0)),   # Q
                pl.BlockSpec((1, tk, Cqp), lambda b, qi, ki: (b, ki, 0)),   # K
                pl.BlockSpec((1, tk, Cp), lambda b, qi, ki: (b, ki, 0)),    # V
                pl.BlockSpec((1, tq, Cp), lambda b, qi, ki: (b, qi, 0)),    # x (residual)
            ],
            out_specs=pl.BlockSpec((1, tq, Cp), lambda b, qi, ki: (b, qi, 0)),
            scratch_shapes=[
                pltpu.VMEM((tq, 1), jnp.float32),    # running max
                pltpu.VMEM((tq, 1), jnp.float32),    # running sum
                pltpu.VMEM((tq, Cp), jnp.float32),   # output accumulator
            ],
        ),
        compiler_params=pltpu.CompilerParams(
            dimension_semantics=("parallel", "parallel", "arbitrary"),
            vmem_limit_bytes=32 * 1024 * 1024),
    )(gamma1, q_all, k_all, v_all, x_pad)

    # ---- glue back: (B, N, Cp) -> NCHW, drop channel padding ----
    return jnp.transpose(out_pad[:, :, :C], (0, 2, 1)).reshape(B, C, H, W)


def pam_module_ref(x_nchw, wq, bq, wk, bk, wv, bv, gamma):
    """Pure-JAX (f32) reference mirroring the PyTorch forward."""
    B, C, H, W = x_nchw.shape
    N = H * W
    x_flat = x_nchw.reshape(B, C, N)                                    # (B, C, N)
    proj_q = jnp.einsum("oc,bcn->bno", wq, x_flat) + bq                 # (B, N, Cq)
    proj_k = jnp.einsum("oc,bcn->bon", wk, x_flat) + bk[None, :, None]  # (B, Cq, N)
    energy = jnp.einsum("bno,bom->bnm", proj_q, proj_k)                 # (B, N, N)
    attn = jax.nn.softmax(energy, axis=-1)
    proj_v = jnp.einsum("oc,bcn->bon", wv, x_flat) + bv[None, :, None]  # (B, C, N)
    out = jnp.einsum("bcm,bnm->bcn", proj_v, attn)                      # (B, C, N)
    out = out.reshape(B, C, H, W)
    return gamma * out + x_nchw


if __name__ == "__main__":
    # Small shapes consistent with the module: in_dim must be >= 16 (C // 16 heads).
    B, C, H, W = 2, 32, 16, 16
    Cq = C // 16

    key = jax.random.PRNGKey(0)
    k_x, k_wq, k_bq, k_wk, k_bk, k_wv, k_bv = jax.random.split(key, 7)

    x = jax.random.normal(k_x, (B, C, H, W), dtype=jnp.float32)

    # Deterministic parameter init (1x1 conv kernels squeezed to 2-D).
    wq = jax.random.normal(k_wq, (Cq, C), dtype=jnp.float32) * 0.1
    bq = jax.random.normal(k_bq, (Cq,), dtype=jnp.float32) * 0.1
    wk = jax.random.normal(k_wk, (Cq, C), dtype=jnp.float32) * 0.1
    bk = jax.random.normal(k_bk, (Cq,), dtype=jnp.float32) * 0.1
    wv = jax.random.normal(k_wv, (C, C), dtype=jnp.float32) * 0.1
    bv = jax.random.normal(k_bv, (C,), dtype=jnp.float32) * 0.1
    gamma = jnp.zeros((1,), dtype=jnp.float32)  # nn.Parameter(torch.zeros(1))

    out = jax.block_until_ready(pam_module_pallas(x, wq, bq, wk, bk, wv, bv, gamma))
    ref = pam_module_ref(x, wq, bq, wk, bk, wv, bv, gamma)
    assert out.shape == (B, C, H, W)
    # bf16 MXU inputs + approx reciprocal -> compare with a loosened tolerance.
    assert jnp.allclose(out, ref, atol=2e-2, rtol=2e-2), "mismatch vs reference"

    # Also check with a non-zero gamma so the attention path is exercised.
    gamma_nz = jnp.array([0.7], dtype=jnp.float32)
    out2 = jax.block_until_ready(pam_module_pallas(x, wq, bq, wk, bk, wv, bv, gamma_nz))
    ref2 = pam_module_ref(x, wq, bq, wk, bk, wv, bv, gamma_nz)
    assert jnp.allclose(out2, ref2, atol=2e-2, rtol=2e-2), "mismatch vs reference (gamma!=0)"

    print("KERNEL_OK")
</pallas_src>

<mosaic_0001>
module attributes {stable_mosaic.version = 11 : i64} {
  func.func @_proj_kernel(%arg0: i32, %arg1: i32, %arg2: memref<1x256x128xf32, #tpu.memory_space<vmem>>, %arg3: memref<128x128xbf16, #tpu.memory_space<vmem>>, %arg4: memref<1x128xf32, #tpu.memory_space<vmem>>, %arg5: memref<128x128xbf16, #tpu.memory_space<vmem>>, %arg6: memref<1x128xf32, #tpu.memory_space<vmem>>, %arg7: memref<128x128xbf16, #tpu.memory_space<vmem>>, %arg8: memref<1x128xf32, #tpu.memory_space<vmem>>, %arg9: memref<1x256x128xbf16, #tpu.memory_space<vmem>>, %arg10: memref<1x256x128xbf16, #tpu.memory_space<vmem>>, %arg11: memref<1x256x128xbf16, #tpu.memory_space<vmem>>) attributes {dimension_semantics = [#tpu.dimension_semantics<parallel>, #tpu.dimension_semantics<parallel>], iteration_bounds = array<i64: 2, 1>, scalar_prefetch = 0 : i64, scratch_operands = 0 : i64, tpu.core_type = #tpu.core_type<tc>, window_params = [{transform_indices = @transform_0, window_bounds = array<i64: 1, 256, 128>}, {pipeline_mode = #tpu.pipeline_mode<synchronous>, transform_indices = @transform_1, window_bounds = array<i64: 128, 128>}, {pipeline_mode = #tpu.pipeline_mode<synchronous>, transform_indices = @transform_2, window_bounds = array<i64: 1, 128>}, {pipeline_mode = #tpu.pipeline_mode<synchronous>, transform_indices = @transform_3, window_bounds = array<i64: 128, 128>}, {pipeline_mode = #tpu.pipeline_mode<synchronous>, transform_indices = @transform_4, window_bounds = array<i64: 1, 128>}, {pipeline_mode = #tpu.pipeline_mode<synchronous>, transform_indices = @transform_5, window_bounds = array<i64: 128, 128>}, {pipeline_mode = #tpu.pipeline_mode<synchronous>, transform_indices = @transform_6, window_bounds = array<i64: 1, 128>}, {transform_indices = @transform_7, window_bounds = array<i64: 1, 256, 128>}, {transform_indices = @transform_8, window_bounds = array<i64: 1, 256, 128>}, {transform_indices = @transform_9, window_bounds = array<i64: 1, 256, 128>}]} {
    %c0 = arith.constant 0 : index
    %c0_0 = arith.constant 0 : index
    %c0_1 = arith.constant 0 : index
    %0 = vector.load %arg2[%c0, %c0_0, %c0_1] : memref<1x256x128xf32, #tpu.memory_space<vmem>>, vector<1x256x128xf32>
    %1 = vector.shape_cast %0 : vector<1x256x128xf32> to vector<256x128xf32>
    %2 = arith.truncf %1 : vector<256x128xf32> to vector<256x128xbf16>
    %c0_2 = arith.constant 0 : index
    %c0_3 = arith.constant 0 : index
    %3 = vector.load %arg3[%c0_2, %c0_3] : memref<128x128xbf16, #tpu.memory_space<vmem>>, vector<128x128xbf16>
    %cst = arith.constant dense<0.000000e+00> : vector<256x128xf32>
    %4 = tpu.matmul %2, %3, %cst {dimension_numbers = #tpu.dot_dimension_numbers<[1], [0], [0], [1], [0, 0, 1, 1], [], []>} : vector<256x128xbf16>, vector<128x128xbf16>, vector<256x128xf32> -> vector<256x128xf32>
    %c0_4 = arith.constant 0 : index
    %c0_5 = arith.constant 0 : index
    %5 = vector.load %arg4[%c0_4, %c0_5] : memref<1x128xf32, #tpu.memory_space<vmem>>, vector<1x128xf32>
    %6 = vector.broadcast %5 : vector<1x128xf32> to vector<256x128xf32>
    %7 = arith.addf %4, %6 : vector<256x128xf32>
    %c0_6 = arith.constant 0 : index
    %c0_7 = arith.constant 0 : index
    %8 = vector.load %arg5[%c0_6, %c0_7] : memref<128x128xbf16, #tpu.memory_space<vmem>>, vector<128x128xbf16>
    %cst_8 = arith.constant dense<0.000000e+00> : vector<256x128xf32>
    %9 = tpu.matmul %2, %8, %cst_8 {dimension_numbers = #tpu.dot_dimension_numbers<[1], [0], [0], [1], [0, 0, 1, 1], [], []>} : vector<256x128xbf16>, vector<128x128xbf16>, vector<256x128xf32> -> vector<256x128xf32>
    %c0_9 = arith.constant 0 : index
    %c0_10 = arith.constant 0 : index
    %10 = vector.load %arg6[%c0_9, %c0_10] : memref<1x128xf32, #tpu.memory_space<vmem>>, vector<1x128xf32>
    %11 = vector.broadcast %10 : vector<1x128xf32> to vector<256x128xf32>
    %12 = arith.addf %9, %11 : vector<256x128xf32>
    %c0_11 = arith.constant 0 : index
    %c0_12 = arith.constant 0 : index
    %13 = vector.load %arg7[%c0_11, %c0_12] : memref<128x128xbf16, #tpu.memory_space<vmem>>, vector<128x128xbf16>
    %cst_13 = arith.constant dense<0.000000e+00> : vector<256x128xf32>
    %14 = tpu.matmul %2, %13, %cst_13 {dimension_numbers = #tpu.dot_dimension_numbers<[1], [0], [0], [1], [0, 0, 1, 1], [], []>} : vector<256x128xbf16>, vector<128x128xbf16>, vector<256x128xf32> -> vector<256x128xf32>
    %c0_14 = arith.constant 0 : index
    %c0_15 = arith.constant 0 : index
    %15 = vector.load %arg8[%c0_14, %c0_15] : memref<1x128xf32, #tpu.memory_space<vmem>>, vector<1x128xf32>
    %16 = vector.broadcast %15 : vector<1x128xf32> to vector<256x128xf32>
    %17 = arith.addf %14, %16 : vector<256x128xf32>
    %18 = arith.truncf %7 : vector<256x128xf32> to vector<256x128xbf16>
    %c0_16 = arith.constant 0 : index
    %c0_17 = arith.constant 0 : index
    %c0_18 = arith.constant 0 : index
    %19 = vector.load %arg9[%c0_16, %c0_17, %c0_18] : memref<1x256x128xbf16, #tpu.memory_space<vmem>>, vector<1x256x128xbf16>
    %20 = vector.shape_cast %19 : vector<1x256x128xbf16> to vector<256x128xbf16>
    %21 = vector.shape_cast %18 : vector<256x128xbf16> to vector<1x256x128xbf16>
    tpu.vector_store %arg9[%c0_16, %c0_17, %c0_18], %21 {strides = array<i32>} : memref<1x256x128xbf16, #tpu.memory_space<vmem>>, vector<1x256x128xbf16>,
    %22 = arith.truncf %12 : vector<256x128xf32> to vector<256x128xbf16>
    %c0_19 = arith.constant 0 : index
    %c0_20 = arith.constant 0 : index
    %c0_21 = arith.constant 0 : index
    %23 = vector.load %arg10[%c0_19, %c0_20, %c0_21] : memref<1x256x128xbf16, #tpu.memory_space<vmem>>, vector<1x256x128xbf16>
    %24 = vector.shape_cast %23 : vector<1x256x128xbf16> to vector<256x128xbf16>
    %25 = vector.shape_cast %22 : vector<256x128xbf16> to vector<1x256x128xbf16>
    tpu.vector_store %arg10[%c0_19, %c0_20, %c0_21], %25 {strides = array<i32>} : memref<1x256x128xbf16, #tpu.memory_space<vmem>>, vector<1x256x128xbf16>,
    %26 = arith.truncf %17 : vector<256x128xf32> to vector<256x128xbf16>
    %c0_22 = arith.constant 0 : index
    %c0_23 = arith.constant 0 : index
    %c0_24 = arith.constant 0 : index
    %27 = vector.load %arg11[%c0_22, %c0_23, %c0_24] : memref<1x256x128xbf16, #tpu.memory_space<vmem>>, vector<1x256x128xbf16>
    %28 = vector.shape_cast %27 : vector<1x256x128xbf16> to vector<256x128xbf16>
    %29 = vector.shape_cast %26 : vector<256x128xbf16> to vector<1x256x128xbf16>
    tpu.vector_store %arg11[%c0_22, %c0_23, %c0_24], %29 {strides = array<i32>} : memref<1x256x128xbf16, #tpu.memory_space<vmem>>, vector<1x256x128xbf16>,
    return
  }
  func.func @transform_0(%arg0: i32, %arg1: i32) -> (i32, i32, i32) {
    %c0_i32 = arith.constant 0 : i32
    %c0_i32_0 = arith.constant 0 : i32
    return %arg0, %arg1, %c0_i32 : i32, i32, i32
  }
  func.func @transform_1(%arg0: i32, %arg1: i32) -> (i32, i32) {
    %c0_i32 = arith.constant 0 : i32
    %c0_i32_0 = arith.constant 0 : i32
    %c0_i32_1 = arith.constant 0 : i32
    return %c0_i32, %c0_i32_0 : i32, i32
  }
  func.func @transform_2(%arg0: i32, %arg1: i32) -> (i32, i32) {
    %c0_i32 = arith.constant 0 : i32
    %c0_i32_0 = arith.constant 0 : i32
    %c0_i32_1 = arith.constant 0 : i32
    return %c0_i32, %c0_i32_0 : i32, i32
  }
  func.func @transform_3(%arg0: i32, %arg1: i32) -> (i32, i32) {
    %c0_i32 = arith.constant 0 : i32
    %c0_i32_0 = arith.constant 0 : i32
    %c0_i32_1 = arith.constant 0 : i32
    return %c0_i32, %c0_i32_0 : i32, i32
  }
  func.func @transform_4(%arg0: i32, %arg1: i32) -> (i32, i32) {
    %c0_i32 = arith.constant 0 : i32
    %c0_i32_0 = arith.constant 0 : i32
    %c0_i32_1 = arith.constant 0 : i32
    return %c0_i32, %c0_i32_0 : i32, i32
  }
  func.func @transform_5(%arg0: i32, %arg1: i32) -> (i32, i32) {
    %c0_i32 = arith.constant 0 : i32
    %c0_i32_0 = arith.constant 0 : i32
    %c0_i32_1 = arith.constant 0 : i32
    return %c0_i32, %c0_i32_0 : i32, i32
  }
  func.func @transform_6(%arg0: i32, %arg1: i32) -> (i32, i32) {
    %c0_i32 = arith.constant 0 : i32
    %c0_i32_0 = arith.constant 0 : i32
    %c0_i32_1 = arith.constant 0 : i32
    return %c0_i32, %c0_i32_0 : i32, i32
  }
  func.func @transform_7(%arg0: i32, %arg1: i32) -> (i32, i32, i32) {
    %c0_i32 = arith.constant 0 : i32
    %c0_i32_0 = arith.constant 0 : i32
    return %arg0, %arg1, %c0_i32 : i32, i32, i32
  }
  func.func @transform_8(%arg0: i32, %arg1: i32) -> (i32, i32, i32) {
    %c0_i32 = arith.constant 0 : i32
    %c0_i32_0 = arith.constant 0 : i32
    return %arg0, %arg1, %c0_i32 : i32, i32, i32
  }
  func.func @transform_9(%arg0: i32, %arg1: i32) -> (i32, i32, i32) {
    %c0_i32 = arith.constant 0 : i32
    %c0_i32_0 = arith.constant 0 : i32
    return %arg0, %arg1, %c0_i32 : i32, i32, i32
  }
}

</mosaic_0001>

<bundles_post_ra>
// kernel: tpu_custom_call.1
= control target key start
LH: loop header
LB: loop body
LE: loop exit
PB: predicated region body
PF: predicated region fallthrough
CT: control target
= control target key end

     0   :  { %s3767_s0 = inlined_call_operand.hbm [shape: f32[2,256,128], index: 0, kind: input, shape index: {}]   ;;  %s3768_s1 = inlined_call_operand.hbm [shape: bf16[128,128], index: 1, kind: input, shape index: {}]   ;;  %s3769_s2 = inlined_call_operand.vmem [shape: f32[1,128], index: 2, kind: input, shape index: {}]   ;;  %s3770_s3 = inlined_call_operand.hbm [shape: bf16[128,128], index: 3, kind: input, shape index: {}]   ;;  %s3771_s4 = inlined_call_operand.vmem [shape: f32[1,128], index: 4, kind: input, shape index: {}]   ;;  %s3772_s5 = inlined_call_operand.hbm [shape: bf16[128,128], index: 5, kind: input, shape index: {}]   ;;  %s3773_s6 = inlined_call_operand.vmem [shape: f32[1,128], index: 6, kind: input, shape index: {}]   ;;  %s3774_s7 = inlined_call_operand.hbm [shape: bf16[2,256,128], index: 7, kind: output, shape index: {0}]   ;;  %s3775_s8 = inlined_call_operand.hbm [shape: bf16[2,256,128], index: 8, kind: output, shape index: {1}]   ;;  %s3776_s9 = inlined_call_operand.hbm [shape: bf16[2,256,128], index: 9, kind: output, shape index: {2}]  }
   0x1   :  { %3789 = sst [smem:[#allocation21_spill]] %s3767_s0 }
   0x2   :  { %3790 = sst [smem:[#allocation22_spill]] %s3771_s4 }
   0x3   :  { %3791 = sst [smem:[#allocation23_spill]] %s3775_s8 }
   0x4   :  { %3792 = sst [smem:[#allocation24_spill]] %s3776_s9 }
   0x5   :  { %15 = vsyncpa [#allocation3], 0 }
   0x6   :  { %17 = vsyncpa [#allocation3 + $0x1], 0 }
   0x7   :  { %18 = vsyncpa [#allocation6], 0 }
   0x8   :  { %19 = vsyncpa [#allocation9], 0 }
   0x9   :  { %20 = vsyncpa [#allocation4], 0 }
   0xa   :  { %22 = vsyncpa [#allocation4 + $0x1], 0 }
   0xb   :  { %23 = vsyncpa [#allocation12], 0 }
   0xc   :  { %25 = vsyncpa [#allocation12 + $0x1], 0  ;;  %s3140_s30 = smov 0   ;;  %s3142_s10 = smov 0  }
   0xd   :  { %s3144_s11 = smov 0   ;;  %s3146_s12 = smov 0  }
   0xe   :  { %s3148_s13 = smov 0   ;;  %s3150_s14 = smov 0  }
   0xf LB: > { %3793 = sst [smem:[#allocation19_spill]] %s3055_s30  ;;  %s3171_s15 = sadd.s32 4294967295, %s3075_s14   ;;  %s3075_s14 = sphi %s3150_s14, %s31_s14   ;;  %s3071_s13 = sphi %s3148_s13, %s3825_s13   ;;  %s3067_s12 = sphi %s3146_s12, %s3824_s12   ;;  %s3063_s11 = sphi %s3144_s11, %s3823_s11   ;;  %s3059_s10 = sphi %s3142_s10, %s3822_s10   ;;  %s3055_s30 = sphi %s3140_s30, %s3821_s30  }
  0x10   : > { %s3777_s16 = sadd.s32 4294967294, %s3075_s14   ;;  %p65_p0 = scmp.ne.s32.totalorder %s3059_s10, %s3055_s30 }
  0x11   : > { %p3779_p1 = scmp.eq.s32.totalorder %s3171_s15, 0  ;;  %p223_p3 = scmp.eq.s32.totalorder %s3777_s16, 1 }
  0x12   : > { %p1911_p5 = scmp.ge.s32.totalorder %s3075_s14, 1  ;;  %p286_p7 = scmp.lt.s32.totalorder %s3075_s14, 3 }
  0x13   : > { %p3182_p4 = por %p3779_p1, %p65_p0  ;;  %p3187_p6 = por %p223_p3, %p65_p0 }
  0x14   : > { %p3192_p8 = pnand %p1911_p5, %p286_p7  ;;  %s3077_s20 = smov [#allocation5]  }
  0x15   : > { %s3794_s17 = scalar_select %p3182_p4, 1, 0 }
  0x16   : > { %s3795_s18 = scalar_select %p3187_p6, 1, 0 }
  0x17   : > { %s3797_s19 = scalar_select %p3192_p8, 1, 0 }
  0x18   : > { %3796 = sst [smem:[#allocation20_spill]] %s3795_s18  ;;  %s298_s21 = sshll.u32 %s3077_s20, 4  ;;  %s3196_s21 = int_to_ptr.vmem [resolvable:$true] %s298_s21 }
  0x19   : > { %p2698_p9 = pneg %p3192_p8  ;;  %s3078_s23 = smov [#allocation7]  }
  0x1a   : > { %s314_s24 = sshll.u32 %s3078_s23, 4  ;;  %s3079_s25 = smov [#allocation8]   ;;  %s3207_s24 = int_to_ptr.vmem [resolvable:$true] %s314_s24 }
  0x1b   : > { %p3203_p11 = pnand %p2698_p9, %p3779_p1  ;;  %s3209_s26 = sshll.u32 %s3079_s25, 4  ;;  %s331_s26 = int_to_ptr.vmem [resolvable:$true] %s3209_s26 }
  0x1c   : > { %s2811_s29 = scalar_lea.hbm %s3768_s1, 1024 }
  0x1d   : > { %p2812_p12 = scmp.ne.s32.totalorder %s3768_s1, %s2811_s29  ;;  %p3219_p13 = pneg %p3203_p11 }
  0x1e   : > { %p2818_p5 = scmp.lt.u32.totalorder %s2811_s29, %s3768_s1 }
  0x1f   : > { %p2814_p0 = pnand %p3219_p13, %p2812_p12 }
  0x21   : > { %p2815_p3 = pneg %p2814_p0 }
  0x23   : > { %p2820_p7 = pnand %p2818_p5, %p2815_p3 }
  0x25   : > { %2823 = shalt.err (!%p2820_p7)
}
  0x26   : > { %s2824_s16 = scalar_lea.vmem %s3196_s21, 1024  ;;  %p2832_p2 = scmp.lt.s32.totalorder %s3196_s21, %s3196_s21 }
  0x27   : > { %p2825_p9 = scmp.ne.s32.totalorder %s3196_s21, %s2824_s16  ;;  %p2833_p6 = scmp.lt.s32.totalorder %s2824_s16, %s2824_s16 }
  0x29   : > { %p2827_p10 = pnand %p2825_p9, %p3219_p13  ;;  %p2834_p12 = por %p2833_p6, %p2832_p2 }
  0x2b   : > { %p2828_p1 = pneg %p2827_p10 }
  0x2d   : > { %p2835_p0 = pnand %p2834_p12, %p2828_p1 }
  0x2f   : > { %2838 = shalt.err (!%p2835_p0)
}
  0x30   : > { %s3080_s27 = smov 64   ;;  %s3081_s28 = smov 4  }
  0x31   : > { %2701 = dma.hbm_to_vmem [thread:$0]  (!%p3203_p11), %s3768_s1, 1024, %s3196_s21, [#allocation6], %s3080_s27, %s3080_s27, %s3081_s28  }
  0x32   : > { %s2839_s16 = scalar_lea.hbm %s3770_s3, 1024 }
  0x33   : > { %p2840_p1 = scmp.ne.s32.totalorder %s3770_s3, %s2839_s16  ;;  %p2846_p10 = scmp.lt.u32.totalorder %s2839_s16, %s3770_s3 }
  0x35   : > { %p2842_p2 = pnand %p2840_p1, %p3219_p13 }
  0x37   : > { %p2843_p6 = pneg %p2842_p2 }
  0x39   : > { %p2848_p3 = pnand %p2846_p10, %p2843_p6 }
  0x3b   : > { %2851 = shalt.err (!%p2848_p3)
}
  0x3c   : > { %s2852_s21 = scalar_lea.vmem %s3207_s24, 1024  ;;  %p2860_p12 = scmp.lt.s32.totalorder %s3207_s24, %s3207_s24 }
  0x3d   : > { %p2853_p5 = scmp.ne.s32.totalorder %s3207_s24, %s2852_s21  ;;  %p2861_p0 = scmp.lt.s32.totalorder %s2852_s21, %s2852_s21 }
  0x3f   : > { %p2855_p7 = pnand %p2853_p5, %p3219_p13  ;;  %p2862_p1 = por %p2861_p0, %p2860_p12 }
  0x41   : > { %p2856_p9 = pneg %p2855_p7 }
  0x43   : > { %p2863_p2 = pnand %p2862_p1, %p2856_p9 }
  0x45   : > { %2866 = shalt.err (!%p2863_p2)
}
  0x46   : > { %2704 = dma.hbm_to_vmem [thread:$0]  (!%p3203_p11), %s3770_s3, 1024, %s3207_s24, [#allocation6], %s3080_s27, %s3080_s27, %s3081_s28  }
  0x47   : > { %s2867_s29 = scalar_lea.hbm %s3772_s5, 1024 }
  0x48   : > { %p2868_p6 = scmp.ne.s32.totalorder %s3772_s5, %s2867_s29  ;;  %p2874_p5 = scmp.lt.u32.totalorder %s2867_s29, %s3772_s5 }
  0x4a   : > { %p2870_p10 = pnand %p2868_p6, %p3219_p13 }
  0x4c   : > { %p2871_p3 = pneg %p2870_p10 }
  0x4e   : > { %p2876_p7 = pnand %p2874_p5, %p2871_p3 }
  0x50   : > { %2879 = shalt.err (!%p2876_p7)
}
  0x51   : > { %s2880_s21 = scalar_lea.vmem %s331_s26, 1024  ;;  %p2888_p1 = scmp.lt.s32.totalorder %s331_s26, %s331_s26 }
  0x52   : > { %p2881_p9 = scmp.ne.s32.totalorder %s331_s26, %s2880_s21  ;;  %p2889_p2 = scmp.lt.s32.totalorder %s2880_s21, %s2880_s21 }
  0x54   : > { %p2883_p12 = pnand %p2881_p9, %p3219_p13  ;;  %p2890_p4 = por %p2889_p2, %p2888_p1 }
  0x56   : > { %p2884_p0 = pneg %p2883_p12 }
  0x58   : > { %p2891_p8 = pnand %p2890_p4, %p2884_p0 }
  0x5a   : > { %2894 = shalt.err (!%p2891_p8)
}
  0x5b   : > { %2707 = dma.hbm_to_vmem [thread:$0]  (!%p3203_p11), %s3772_s5, 1024, %s331_s26, [#allocation9], %s3080_s27, %s3080_s27, %s3081_s28  }
  0x5c   : > { %s52_s18 = sadd.s32 1, %s3063_s11  ;;  %s43_s22 = sadd.s32 1, %s3071_s13 }
  0x5d   : > { %p59_p4 = scmp.ne.s32.totalorder %s3063_s11, %s3059_s10  ;;  %p45_p8 = scmp.ge.s32.totalorder %s43_s22, 2 }
  0x5e   : > { %p60_p13 = scmp.eq.s32.totalorder %s3075_s14, 0  ;;  %p3800_p6 = scmp.eq.s32.totalorder %s3171_s15, 1 }
  0x5f   : > { %p2725_p3 = scmp.lt.s32.totalorder %s3075_s14, 2  ;;  %s3827_s22 = smov (%p45_p8, %s43_s22), 0 }
  0x60   : > { %p3298_p10 = por %p3800_p6, %p59_p4  ;;  %p61_p5 = por %p60_p13, %p59_p4 }
  0x61   : > { %s347_s9 = sand.u32 1, %s3063_s11   ;;  %s47_s30 = ssub.s32 %s3071_s13, %s3827_s22 }
  0x62   : > { %p50_p7 = scmp.eq.s32.totalorder %s47_s30, 0  ;;  %s1916_s26 = sshll.u32 %s347_s9, 8 }
  0x63   : > { %s2061_s27 = sshll.u32 %s3071_s13, 12  ;;  %s3802_s0 = sld [smem:[#allocation21_spill]] }
  0x64   : > { %s3310_s28 = scalar_select %p50_p7, %s3063_s11, %s52_s18  }
  0x65   : > { %s351_s25 = scalar_lea.vmem [#allocation2], %s1916_s26  ;;  %p3321_p11 = pnand %p2725_p3, %p61_p5 }
  0x66   : > { %s360_s16 = sshll.u32 %s351_s25, 4  ;;  %s3325_s24 = scalar_lea.sflag [#allocation3], %s347_s9  ;;  %s3317_s16 = int_to_ptr.vmem [resolvable:$true] %s360_s16 }
  0x67   : > { %p2897_p12 = pneg %p3321_p11 }
  0x69   : > { %s3315_s23 = scalar_lea.hbm %s3802_s0, %s2061_s27  ;;  %s2900_s26 = scalar_lea.hbm %s3802_s0, 8192 }
  0x6a   : > { %s2895_s4 = scalar_lea.hbm %s3315_s23, 4096  ;;  %p2901_p2 = scmp.lt.u32.totalorder %s3315_s23, %s3802_s0 }
  0x6b   : > { %p2896_p9 = scmp.ne.s32.totalorder %s3315_s23, %s2895_s4  ;;  %p2902_p4 = scmp.lt.u32.totalorder %s2900_s26, %s2895_s4 }
  0x6c   : > { %p2904_p13 = scmp.lt.u32.totalorder %s2895_s4, %s3315_s23 }
  0x6d   : > { %p2898_p0 = pnand %p2897_p12, %p2896_p9  ;;  %p2903_p8 = por %p2902_p4, %p2901_p2 }
  0x6f   : > { %p2899_p1 = pneg %p2898_p0  ;;  %p2905_p6 = por %p2904_p13, %p2903_p8 }
  0x71   : > { %p2906_p3 = pnand %p2905_p6, %p2899_p1 }
  0x73   : > { %2909 = shalt.err (!%p2906_p3)
}
  0x74   : > { %s2910_s9 = scalar_lea.vmem %s3317_s16, 4096  ;;  %s3082_s20 = smov [#allocation2]  }
  0x75   : > { %p2911_p5 = scmp.ne.s32.totalorder %s3317_s16, %s2910_s9  ;;  %s2915_s25 = sshll.u32 %s3082_s20, 4  ;;  %s2916_s25 = int_to_ptr.vmem [resolvable:$false] %s2915_s25 }
  0x76   : > { %s2917_s18 = scalar_lea.vmem %s2916_s25, 8192  ;;  %p2918_p0 = scmp.lt.s32.totalorder %s3317_s16, %s2916_s25 }
  0x77   : > { %p2913_p7 = pnand %p2911_p5, %p2897_p12  ;;  %p2919_p2 = scmp.lt.s32.totalorder %s2917_s18, %s2910_s9 }
  0x79   : > { %p2914_p9 = pneg %p2913_p7  ;;  %p2920_p4 = por %p2919_p2, %p2918_p0 }
  0x7b   : > { %p2921_p8 = pnand %p2920_p4, %p2914_p9 }
  0x7d   : > { %2924 = shalt.err (!%p2921_p8)
}
  0x7e   : > { %s3083_s4 = smov 128   ;;  %s3084_s30 = smov 8  }
  0x7f   : > { %2711 = dma.hbm_to_vmem [thread:$0]  (!%p3321_p11), %s3315_s23, 4096, %s3317_s16, %s3325_s24, %s3083_s4, %s3083_s4, %s3084_s30  }
  0x80   : > { %p3804_p12 = scmp.ne.s32.totalorder %s3797_s19, 0 }
  0x81   : > { %s3356_s26 = sand.u32 (!%p3804_p12), 1, %s3059_s10   ;;  %p3805_p1 = scmp.ne.s32.totalorder (!%p3804_p12), %s3794_s17, 0 }
  0x82   : > { %372 = sbr.rel (%p3804_p12) target bundleno = 521 (0x209), region = 48  ;;  %s1920_s27 = sshll.u32 (!%p3804_p12), %s3356_s26, 8 }
  0x83   : > { %s375_s29 = scalar_lea.sflag (!%p3804_p12), [#allocation3], %s3356_s26  ;;  %s3360_s9 = scalar_lea.vmem (!%p3804_p12), [#allocation2], %s1920_s27 }
  0x89   : > { %3034 = dma.done.wait (%p3805_p1), %s375_s29, 4096  }
  0x8a   : > { %3036 = vsyncadd (%p3805_p1), %s375_s29, 4294963200  ;;  %p3806_p11 = scmp.eq.s32.totalorder %s3171_s15, 0 }
  0x8c   : > { %3038 = dma.done.wait (%p3806_p11), [#allocation6], 2048   ;;  %p3807_p13 = pmov %p3806_p11 }
  0x8d   : > { %p3808_p6 = pmov %p3806_p11 }
  0x8e   : > { %3040 = vsyncadd (%p3807_p13), [#allocation6], 4294965248 }
  0x8f   : > { %3042 = dma.done.wait (%p3808_p6), [#allocation9], 1024   ;;  %p3809_p3 = pmov %p3808_p6 }
  0x90   : > { %v2787_v0 = vld [vmem:[#allocation5] sm:$0xff]   ;;  %v2788_v1 = vld [vmem:[#allocation5 + $0x8] sm:$0xff]   ;;  %v2789_v2 = vld [vmem:[#allocation5 + $0x10] sm:$0xff]   ;;  %s3468_s23 = sshll.u32 %s3356_s26, 7  ;;  %s3513_s21 = sshll.u32 %s3067_s12, 11 }
  0x91   : > { %3044 = vsyncadd (%p3809_p3), [#allocation9], 4294966272  ;;  %2518 = vmatprep.subr.bf16.mxu0 %v2787_v0  ;;  %2662 = vmatprep.subr.bf16.mxu1 %v2787_v0  ;;  %v2790_v3 = vld [vmem:[#allocation5 + $0x18] sm:$0xff]   ;;  %v440_v4 = vld [vmem:[%s3360_s9] sm:$0xff]  ;;  %s3478_s16 = scalar_lea.vmem [#allocation10], %s3468_s23  ;;  %s3529_s4 = scalar_lea.hbm %s3774_s7, %s3513_s21 }
  0x92   : > { %2519 = vmatpush3.bf16.msra.mxu0 %v2787_v0  ;;  %2670 = vmatpush3.bf16.msra.mxu1 %v2787_v0  ;;  %v441_v5 = vld [vmem:[%s3360_s9 + $0x8] sm:$0xff]  ;;  %v456_v6 = vld [vmem:[%s3360_s9 + $0x80] sm:$0xff]  ;;  %v2793_v12 = vld [vmem:[#allocation5 + $0x30] sm:$0xff]   ;;  %s1690_s24 = sshll.u32 %s3478_s16, 4  ;;  %s3810_s29 = sld [smem:[#allocation22_spill]]  ;;  %s3531_s24 = int_to_ptr.vmem [resolvable:$true] %s1690_s24 }
  0x93   : > { %2520 = vmatprep.subr.bf16.mxu0 %v2788_v1  ;;  %2663 = vmatprep.subr.bf16.mxu1 %v2788_v1  ;;  %v3377_v7 = vpack.c.bf16 %v441_v5, %v440_v4  ;;  %v457_v8 = vld [vmem:[%s3360_s9 + $0x88] sm:$0xff]  ;;  %v2791_v10 = vld [vmem:[#allocation5 + $0x20] sm:$0xff]   ;;  %v2794_v13 = vld [vmem:[#allocation5 + $0x38] sm:$0xff]   ;;  %s2925_s17 = scalar_lea.vmem %s3531_s24, 2048  ;;  %s3085_s19 = smov [#allocation10]  }
  0x94   : > { %v3380_v9 = vpack.c.bf16 %v457_v8, %v456_v6  ;;  %v2792_v11 = vld [vmem:[#allocation5 + $0x28] sm:$0xff]   ;;  %v442_v14 = vld [vmem:[%s3360_s9 + $0x10] sm:$0xff]  ;;  %v443_v15 = vld [vmem:[%s3360_s9 + $0x18] sm:$0xff]  ;;  %p2926_p5 = scmp.ne.s32.totalorder %s3531_s24, %s2925_s17 }
  0x95   : > { %2534 = vmatprep.mubr.bf16.mxu0 %v3377_v7  ;;  %v458_v16 = vld [vmem:[%s3360_s9 + $0x90] sm:$0xff]  ;;  %v459_v17 = vld [vmem:[%s3360_s9 + $0x98] sm:$0xff]  ;;  %v2795_v18 = vld [vmem:[#allocation7] sm:$0xff]   ;;  %v3390_v22 = vpack.c.bf16 %v443_v15, %v442_v14 }
  0x96   : > { %2521 = vmatpush3.bf16.msra.mxu0 %v2788_v1  ;;  %2671 = vmatpush3.bf16.msra.mxu1 %v2788_v1  ;;  %v2796_v19 = vld [vmem:[#allocation8] sm:$0xff]   ;;  %v445_v21 = vld [vmem:[%s3360_s9 + $0x28] sm:$0xff]  ;;  %v3392_v23 = vpack.c.bf16 %v459_v17, %v458_v16  ;;  %v446_v30 = vld [vmem:[%s3360_s9 + $0x30] sm:$0xff]  ;;  %p2927_p7 = pnand %p2926_p5, %p3298_p10 }
  0x97   : > { %2522 = vmatprep.subr.bf16.mxu0 %v2789_v2  ;;  %2664 = vmatprep.subr.bf16.mxu1 %v2789_v2  ;;  %v444_v20 = vld [vmem:[%s3360_s9 + $0x20] sm:$0xff]  ;;  %v461_v25 = vld [vmem:[%s3360_s9 + $0xa8] sm:$0xff]  ;;  %v447_v31 = vld [vmem:[%s3360_s9 + $0x38] sm:$0xff] }
  0x98   : > { %2550 = vmatprep.mubr.bf16.mxu1 %v3380_v9  ;;  %v460_v24 = vld [vmem:[%s3360_s9 + $0xa0] sm:$0xff]  ;;  %v2797_v26 = vld [vmem:[#allocation7 + $0x8] sm:$0xff]   ;;  %v3396_v28 = vpack.c.bf16 %v445_v21, %v444_v20  ;;  %v462_v32 = vld [vmem:[%s3360_s9 + $0xb0] sm:$0xff]  ;;  %v3409_v37 = vpack.c.bf16 %v447_v31, %v446_v30  ;;  %p2928_p9 = pneg %p2927_p7 }
  0x99   : > { %v2798_v27 = vld [vmem:[#allocation8 + $0x8] sm:$0xff]   ;;  %v3398_v29 = vpack.c.bf16 %v461_v25, %v460_v24  ;;  %v463_v33 = vld [vmem:[%s3360_s9 + $0xb8] sm:$0xff]  ;;  %v2799_v34 = vld [vmem:[#allocation7 + $0x10] sm:$0xff]  }
  0x9a   : > { %2523 = vmatpush3.bf16.msra.mxu0 %v2789_v2  ;;  %2672 = vmatpush3.bf16.msra.mxu1 %v2789_v2  ;;  %v2800_v35 = vld [vmem:[#allocation8 + $0x10] sm:$0xff]   ;;  %v448_v36 = vld [vmem:[%s3360_s9 + $0x40] sm:$0xff]  ;;  %v3411_v38 = vpack.c.bf16 %v463_v33, %v462_v32  ;;  %v449_v39 = vld [vmem:[%s3360_s9 + $0x48] sm:$0xff] }
  0x9b   : > { %2524 = vmatprep.subr.bf16.mxu0 %v2790_v3  ;;  %2665 = vmatprep.subr.bf16.mxu1 %v2790_v3  ;;  %v464_v40 = vld [vmem:[%s3360_s9 + $0xc0] sm:$0xff]  ;;  %v465_v41 = vld [vmem:[%s3360_s9 + $0xc8] sm:$0xff]  ;;  %v2801_v42 = vld [vmem:[#allocation7 + $0x18] sm:$0xff]   ;;  %v3416_v44 = vpack.c.bf16 %v449_v39, %v448_v36 }
  0x9c   : > { %v2802_v43 = vld [vmem:[#allocation8 + $0x18] sm:$0xff]   ;;  %v3418_v45 = vpack.c.bf16 %v465_v41, %v464_v40  ;;  %v450_v46 = vld [vmem:[%s3360_s9 + $0x50] sm:$0xff]  ;;  %v2803_v50 = vld [vmem:[#allocation7 + $0x20] sm:$0xff]  }
  0x9d   : > { %v451_v47 = vld [vmem:[%s3360_s9 + $0x58] sm:$0xff]  ;;  %v466_v48 = vld [vmem:[%s3360_s9 + $0xd0] sm:$0xff]  ;;  %v2804_v51 = vld [vmem:[#allocation8 + $0x20] sm:$0xff]  }
  0x9e   : > { %2525 = vmatpush3.bf16.msra.mxu0 %v2790_v3  ;;  %2673 = vmatpush3.bf16.msra.mxu1 %v2790_v3  ;;  %v467_v49 = vld [vmem:[%s3360_s9 + $0xd8] sm:$0xff]  ;;  %v452_v52 = vld [vmem:[%s3360_s9 + $0x60] sm:$0xff]  ;;  %v477_v53 = vpack.c.bf16 %v451_v47, %v450_v46  ;;  %v453_v55 = vld [vmem:[%s3360_s9 + $0x68] sm:$0xff] }
  0x9f   : > { %2526 = vmatprep.subr.bf16.mxu0 %v2791_v10  ;;  %2666 = vmatprep.subr.bf16.mxu1 %v2791_v10  ;;  %v3429_v54 = vpack.c.bf16 %v467_v49, %v466_v48  ;;  %v468_v56 = vld [vmem:[%s3360_s9 + $0xe0] sm:$0xff]  ;;  %v469_v57 = vld [vmem:[%s3360_s9 + $0xe8] sm:$0xff]  ;;  %v478_v60 = vpack.c.bf16 %v453_v55, %v452_v52  ;;  %v454_v62 = vld [vmem:[%s3360_s9 + $0x70] sm:$0xff] }
  0xa0   : > { %v2805_v58 = vld [vmem:[#allocation7 + $0x28] sm:$0xff]   ;;  %v486_v61 = vpack.c.bf16 %v469_v57, %v468_v56  ;;  %v455_v63 = vld [vmem:[%s3360_s9 + $0x78] sm:$0xff]  ;;  %v470_v0 = vld [vmem:[%s3360_s9 + $0xf0] sm:$0xff] }
  0xa1   : > { %v2806_v59 = vld [vmem:[#allocation8 + $0x28] sm:$0xff]   ;;  %v471_v1 = vld [vmem:[%s3360_s9 + $0xf8] sm:$0xff]  ;;  %v2807_v2 = vld [vmem:[#allocation7 + $0x30] sm:$0xff]   ;;  %v479_v4 = vpack.c.bf16 %v455_v63, %v454_v62  ;;  %s1665_s9 = scalar_lea.sflag [#allocation4], %s3356_s26 }
  0xa2   : > { %2527 = vmatpush3.bf16.msra.mxu0 %v2791_v10  ;;  %2674 = vmatpush3.bf16.msra.mxu1 %v2791_v10  ;;  %v2808_v3 = vld [vmem:[#allocation8 + $0x30] sm:$0xff]   ;;  %v487_v5 = vpack.c.bf16 %v471_v1, %v470_v0  ;;  %v2809_v6 = vld [vmem:[#allocation7 + $0x38] sm:$0xff]  }
  0xa3   : > { %2528 = vmatprep.subr.bf16.mxu0 %v2792_v11  ;;  %2667 = vmatprep.subr.bf16.mxu1 %v2792_v11  ;;  %v2810_v8 = vld [vmem:[#allocation8 + $0x38] sm:$0xff]  }
  0xa6   : > { %2529 = vmatpush3.bf16.msra.mxu0 %v2792_v11  ;;  %2675 = vmatpush3.bf16.msra.mxu1 %v2792_v11 }
  0xa7   : > { %2530 = vmatprep.subr.bf16.mxu0 %v2793_v12  ;;  %2668 = vmatprep.subr.bf16.mxu1 %v2793_v12 }
  0xaa   : > { %2531 = vmatpush3.bf16.msra.mxu0 %v2793_v12  ;;  %2676 = vmatpush3.bf16.msra.mxu1 %v2793_v12 }
  0xab   : > { %2532 = vmatprep.subr.bf16.mxu0 %v2794_v13  ;;  %2669 = vmatprep.subr.bf16.mxu1 %v2794_v13 }
  0xae   : > { %2533 = vmatpush3.bf16.msra.mxu0 %v2794_v13  ;;  %2677 = vmatpush3.bf16.msra.mxu1 %v2794_v13 }
  0xaf   : > { %2566 = vmatprep.subr.bf16.mxu1 %v2795_v18  ;;  %2614 = vmatprep.subr.bf16.mxu0 %v2796_v19 }
  0xb1   : > { %2535 = vmatmul.mubr.bf16.vlgmr.msra.gmra.mrb[0].mxu0 %v3390_v22  ;;  %2551 = vmatmul.mubr.bf16.vlgmr.msra.gmra.mrb[0].mxu1 %v3392_v23 }
  0xb2   : > { %2567 = vmatpush3.bf16.msra.mxu1 %v2795_v18  ;;  %2615 = vmatpush3.bf16.msra.mxu0 %v2796_v19 }
  0xb3   : > { %2568 = vmatprep.subr.bf16.mxu1 %v2797_v26  ;;  %2616 = vmatprep.subr.bf16.mxu0 %v2798_v27 }
  0xb4   : > { %2538 = vmatprep.mubr.bf16.mxu0 %v3396_v28  ;;  %2554 = vmatprep.mubr.bf16.mxu1 %v3398_v29 }
  0xb6   : > { %2569 = vmatpush3.bf16.msra.mxu1 %v2797_v26  ;;  %2617 = vmatpush3.bf16.msra.mxu0 %v2798_v27 }
  0xb7   : > { %2570 = vmatprep.subr.bf16.mxu1 %v2799_v34  ;;  %2618 = vmatprep.subr.bf16.mxu0 %v2800_v35 }
  0xb9   : > { %2539 = vmatmul.mubr.bf16.gmra.mrb[4].mxu0 %v3409_v37  ;;  %2555 = vmatmul.mubr.bf16.gmra.mrb[4].mxu1 %v3411_v38 }
  0xba   : > { %2571 = vmatpush3.bf16.msra.mxu1 %v2799_v34  ;;  %2619 = vmatpush3.bf16.msra.mxu0 %v2800_v35 }
  0xbb   : > { %2572 = vmatprep.subr.bf16.mxu1 %v2801_v42  ;;  %2620 = vmatprep.subr.bf16.mxu0 %v2802_v43 }
  0xbc   : > { %2542 = vmatprep.mubr.bf16.mxu0 %v3416_v44  ;;  %2558 = vmatprep.mubr.bf16.mxu1 %v3418_v45 }
  0xbe   : > { %2573 = vmatpush3.bf16.msra.mxu1 %v2801_v42  ;;  %2621 = vmatpush3.bf16.msra.mxu0 %v2802_v43 }
  0xbf   : > { %2574 = vmatprep.subr.bf16.mxu1 %v2803_v50  ;;  %2622 = vmatprep.subr.bf16.mxu0 %v2804_v51 }
  0xc1   : > { %2543 = vmatmul.mubr.bf16.gmra.mrb[8].mxu0 %v477_v53  ;;  %2559 = vmatmul.mubr.bf16.gmra.mrb[8].mxu1 %v3429_v54 }
  0xc2   : > { %2575 = vmatpush3.bf16.msra.mxu1 %v2803_v50  ;;  %2623 = vmatpush3.bf16.msra.mxu0 %v2804_v51 }
  0xc3   : > { %2576 = vmatprep.subr.bf16.mxu1 %v2805_v58  ;;  %2624 = vmatprep.subr.bf16.mxu0 %v2806_v59 }
  0xc4   : > { %2546 = vmatprep.mubr.bf16.mxu0 %v478_v60  ;;  %2562 = vmatprep.mubr.bf16.mxu1 %v486_v61 }
  0xc6   : > { %2577 = vmatpush3.bf16.msra.mxu1 %v2805_v58  ;;  %2625 = vmatpush3.bf16.msra.mxu0 %v2806_v59 }
  0xc7   : > { %2578 = vmatprep.subr.bf16.mxu1 %v2807_v2  ;;  %2626 = vmatprep.subr.bf16.mxu0 %v2808_v3 }
  0xc9   : > { %2547 = vmatmul.mubr.bf16.gmra.mrb[12].mxu0 %v479_v4  ;;  %2563 = vmatmul.mubr.bf16.gmra.mrb[12].mxu1 %v487_v5 }
  0xca   : > { %2579 = vmatpush3.bf16.msra.mxu1 %v2807_v2  ;;  %2627 = vmatpush3.bf16.msra.mxu0 %v2808_v3 }
  0xcb   : > { %2580 = vmatprep.subr.bf16.mxu1 %v2809_v6  ;;  %2628 = vmatprep.subr.bf16.mxu0 %v2810_v8 }
  0xcc   : > { %2582 = vmatprep.mubr.bf16.mxu1 %v3377_v7  ;;  %2630 = vmatprep.mubr.bf16.mxu0 %v3377_v7  ;;  %v3464_v7 = vld [vmem:[%s3769_s2] ss:$0 sm:$0xff] }
  0xce   : > { %2581 = vmatpush3.bf16.msra.mxu1 %v2809_v6  ;;  %2629 = vmatpush3.bf16.msra.mxu0 %v2810_v8 }
  0xd1   : > { %2583 = vmatmul.mubr.bf16.vlgmr.msra.gmra.mrb[16].mxu1 %v3390_v22  ;;  %2631 = vmatmul.mubr.bf16.vlgmr.msra.gmra.mrb[16].mxu0 %v3390_v22 }
  0xd2   : > { %2586 = vmatprep.mubr.bf16.mxu1 %v3396_v28  ;;  %2634 = vmatprep.mubr.bf16.mxu0 %v3396_v28 }
  0xd9   : > { %2587 = vmatmul.mubr.bf16.gmra.mrb[20].mxu1 %v3409_v37  ;;  %2635 = vmatmul.mubr.bf16.gmra.mrb[20].mxu0 %v3409_v37 }
  0xda   : > { %2590 = vmatprep.mubr.bf16.mxu1 %v3416_v44  ;;  %2638 = vmatprep.mubr.bf16.mxu0 %v3416_v44 }
  0xe1   : > { %2591 = vmatmul.mubr.bf16.gmra.mrb[24].mxu1 %v477_v53  ;;  %2639 = vmatmul.mubr.bf16.gmra.mrb[24].mxu0 %v477_v53 }
  0xe2   : > { %2594 = vmatprep.mubr.bf16.mxu1 %v478_v60  ;;  %2642 = vmatprep.mubr.bf16.mxu0 %v478_v60 }
  0xe9   : > { %2595 = vmatmul.mubr.bf16.gmra.mrb[28].mxu1 %v479_v4  ;;  %2643 = vmatmul.mubr.bf16.gmra.mrb[28].mxu0 %v479_v4 }
  0xea   : > { %2598 = vmatprep.mubr.bf16.mxu1 %v3380_v9  ;;  %2646 = vmatprep.mubr.bf16.mxu0 %v3380_v9 }
  0xf1   : > { %2599 = vmatmul.mubr.bf16.gmra.mrb[32].mxu1 %v3392_v23  ;;  %2647 = vmatmul.mubr.bf16.gmra.mrb[32].mxu0 %v3392_v23 }
  0xf2   : > { %2602 = vmatprep.mubr.bf16.mxu1 %v3398_v29  ;;  %2650 = vmatprep.mubr.bf16.mxu0 %v3398_v29 }
  0xf9   : > { %2603 = vmatmul.mubr.bf16.gmra.mrb[36].mxu1 %v3411_v38  ;;  %2651 = vmatmul.mubr.bf16.gmra.mrb[36].mxu0 %v3411_v38 }
  0xfa   : > { %2606 = vmatprep.mubr.bf16.mxu1 %v3418_v45  ;;  %2654 = vmatprep.mubr.bf16.mxu0 %v3418_v45 }
 0x101   : > { %2607 = vmatmul.mubr.bf16.gmra.mrb[40].mxu1 %v3429_v54  ;;  %2655 = vmatmul.mubr.bf16.gmra.mrb[40].mxu0 %v3429_v54 }
 0x102   : > { %2610 = vmatprep.mubr.bf16.mxu1 %v486_v61  ;;  %2658 = vmatprep.mubr.bf16.mxu0 %v486_v61 }
 0x109   : > { %2611 = vmatmul.mubr.bf16.gmra.mrb[44].mxu1 %v487_v5  ;;  %2659 = vmatmul.mubr.bf16.gmra.mrb[44].mxu0 %v487_v5 }
 0x184   : > { %v2536_v9 = vpop.f32.mrb[0].mxu0  ;;  %v2552_v10 = vpop.f32.mrb[0].mxu1 }
 0x185   : > { %v602_v11 = vadd.f32 %v2536_v9, %v3464_v7  ;;  %v593_v12 = vpop.f32.mrb[1].mxu0  ;;  %v657_v13 = vpop.f32.mrb[1].mxu1  ;;  %v666_v16 = vadd.f32 %v2552_v10, %v3464_v7 }
 0x186   : > { %v2537_v14 = vpop.f32.mrb[2].mxu0  ;;  %v2553_v15 = vpop.f32.mrb[2].mxu1  ;;  %v594_v21 = vadd.f32 %v3464_v7, %v593_v12  ;;  %v658_v22 = vadd.f32 %v3464_v7, %v657_v13 }
 0x187   : > { %v605_v17 = vadd.f32 %v2537_v14, %v3464_v7  ;;  %v669_v18 = vadd.f32 %v2553_v15, %v3464_v7  ;;  %v596_v19 = vpop.f32.mrb[3].mxu0  ;;  %v660_v20 = vpop.f32.mrb[3].mxu1 }
 0x188   : > { %v597_v23 = vadd.f32 %v3464_v7, %v596_v19  ;;  %v661_v24 = vadd.f32 %v3464_v7, %v660_v20 }
 0x189   : > { %v2169_v25 = vpack.c.bf16 %v605_v17, %v602_v11  ;;  %v2209_v26 = vpack.c.bf16 %v669_v18, %v666_v16 }
 0x18a   : > { %v2164_v27 = vpack.c.bf16 %v597_v23, %v594_v21  ;;  %v2204_v28 = vpack.c.bf16 %v661_v24, %v658_v22 }
 0x18b   : > { %2401 = vst [vmem:[%s3478_s16 + $0x8] sm:$0xff] %v2169_v25   ;;  %2409 = vst [vmem:[%s3478_s16 + $0x48] sm:$0xff] %v2209_v26   ;;  %v3523_v26 = vld [vmem:[%s3773_s6] ss:$0 sm:$0xff] }
 0x18c   : > { %2165 = vst [vmem:[%s3478_s16] sm:$0xff] %v2164_v27   ;;  %2408 = vst [vmem:[%s3478_s16 + $0x40] sm:$0xff] %v2204_v28   ;;  %v2540_v29 = vpop.f32.mrb[4].mxu0  ;;  %v2556_v30 = vpop.f32.mrb[4].mxu1  ;;  %v3540_v27 = vld [vmem:[%s3810_s29] ss:$0 sm:$0xff] }
 0x18d   : > { %v618_v31 = vadd.f32 %v2540_v29, %v3464_v7  ;;  %v609_v32 = vpop.f32.mrb[5].mxu0  ;;  %v673_v33 = vpop.f32.mrb[5].mxu1  ;;  %v682_v36 = vadd.f32 %v2556_v30, %v3464_v7 }
 0x18e   : > { %v2541_v34 = vpop.f32.mrb[6].mxu0  ;;  %v2557_v35 = vpop.f32.mrb[6].mxu1  ;;  %v610_v41 = vadd.f32 %v3464_v7, %v609_v32  ;;  %v674_v42 = vadd.f32 %v3464_v7, %v673_v33 }
 0x18f   : > { %v621_v37 = vadd.f32 %v2541_v34, %v3464_v7  ;;  %v685_v38 = vadd.f32 %v2557_v35, %v3464_v7  ;;  %v612_v39 = vpop.f32.mrb[7].mxu0  ;;  %v676_v40 = vpop.f32.mrb[7].mxu1 }
 0x190   : > { %v613_v43 = vadd.f32 %v3464_v7, %v612_v39  ;;  %v677_v44 = vadd.f32 %v3464_v7, %v676_v40 }
 0x191   : > { %v2179_v45 = vpack.c.bf16 %v621_v37, %v618_v31  ;;  %v2219_v46 = vpack.c.bf16 %v685_v38, %v682_v36 }
 0x192   : > { %v2174_v47 = vpack.c.bf16 %v613_v43, %v610_v41  ;;  %v2214_v48 = vpack.c.bf16 %v677_v44, %v674_v42 }
 0x193   : > { %2403 = vst [vmem:[%s3478_s16 + $0x18] sm:$0xff] %v2179_v45   ;;  %2411 = vst [vmem:[%s3478_s16 + $0x58] sm:$0xff] %v2219_v46  }
 0x194   : > { %2402 = vst [vmem:[%s3478_s16 + $0x10] sm:$0xff] %v2174_v47   ;;  %2410 = vst [vmem:[%s3478_s16 + $0x50] sm:$0xff] %v2214_v48   ;;  %v2544_v49 = vpop.f32.mrb[8].mxu0  ;;  %v2560_v50 = vpop.f32.mrb[8].mxu1 }
 0x195   : > { %v634_v51 = vadd.f32 %v2544_v49, %v3464_v7  ;;  %v625_v52 = vpop.f32.mrb[9].mxu0  ;;  %v689_v53 = vpop.f32.mrb[9].mxu1  ;;  %v698_v56 = vadd.f32 %v2560_v50, %v3464_v7 }
 0x196   : > { %v2545_v54 = vpop.f32.mrb[10].mxu0  ;;  %v2561_v55 = vpop.f32.mrb[10].mxu1  ;;  %v626_v61 = vadd.f32 %v3464_v7, %v625_v52  ;;  %v690_v62 = vadd.f32 %v3464_v7, %v689_v53 }
 0x197   : > { %v637_v57 = vadd.f32 %v2545_v54, %v3464_v7  ;;  %v701_v58 = vadd.f32 %v2561_v55, %v3464_v7  ;;  %v628_v59 = vpop.f32.mrb[11].mxu0  ;;  %v692_v60 = vpop.f32.mrb[11].mxu1 }
 0x198   : > { %v629_v63 = vadd.f32 %v3464_v7, %v628_v59  ;;  %v693_v0 = vadd.f32 %v3464_v7, %v692_v60 }
 0x199   : > { %v2189_v1 = vpack.c.bf16 %v637_v57, %v634_v51  ;;  %v2229_v2 = vpack.c.bf16 %v701_v58, %v698_v56 }
 0x19a   : > { %v2184_v3 = vpack.c.bf16 %v629_v63, %v626_v61  ;;  %v2224_v4 = vpack.c.bf16 %v693_v0, %v690_v62 }
 0x19b   : > { %2405 = vst [vmem:[%s3478_s16 + $0x28] sm:$0xff] %v2189_v1   ;;  %2413 = vst [vmem:[%s3478_s16 + $0x68] sm:$0xff] %v2229_v2  }
 0x19c   : > { %2404 = vst [vmem:[%s3478_s16 + $0x20] sm:$0xff] %v2184_v3   ;;  %2412 = vst [vmem:[%s3478_s16 + $0x60] sm:$0xff] %v2224_v4   ;;  %v2548_v5 = vpop.f32.mrb[12].mxu0  ;;  %v2564_v6 = vpop.f32.mrb[12].mxu1 }
 0x19d   : > { %v650_v8 = vadd.f32 %v2548_v5, %v3464_v7  ;;  %v641_v9 = vpop.f32.mrb[13].mxu0  ;;  %v705_v10 = vpop.f32.mrb[13].mxu1  ;;  %v714_v13 = vadd.f32 %v2564_v6, %v3464_v7 }
 0x19e   : > { %v2549_v11 = vpop.f32.mrb[14].mxu0  ;;  %v2565_v12 = vpop.f32.mrb[14].mxu1  ;;  %v642_v18 = vadd.f32 %v3464_v7, %v641_v9  ;;  %v706_v19 = vadd.f32 %v3464_v7, %v705_v10 }
 0x19f   : > { %v653_v14 = vadd.f32 %v2549_v11, %v3464_v7  ;;  %v717_v15 = vadd.f32 %v2565_v12, %v3464_v7  ;;  %v644_v16 = vpop.f32.mrb[15].mxu0  ;;  %v708_v17 = vpop.f32.mrb[15].mxu1 }
 0x1a0   : > { %v645_v20 = vadd.f32 %v3464_v7, %v644_v16  ;;  %v709_v21 = vadd.f32 %v3464_v7, %v708_v17 }
 0x1a1   : > { %v2199_v22 = vpack.c.bf16 %v653_v14, %v650_v8  ;;  %v2239_v23 = vpack.c.bf16 %v717_v15, %v714_v13 }
 0x1a2   : > { %v2194_v24 = vpack.c.bf16 %v645_v20, %v642_v18  ;;  %v2234_v25 = vpack.c.bf16 %v709_v21, %v706_v19 }
 0x1a3   : > { %2407 = vst [vmem:[%s3478_s16 + $0x38] sm:$0xff] %v2199_v22   ;;  %2415 = vst [vmem:[%s3478_s16 + $0x78] sm:$0xff] %v2239_v23  }
 0x1a4   : > { %2406 = vst [vmem:[%s3478_s16 + $0x30] sm:$0xff] %v2194_v24   ;;  %2414 = vst [vmem:[%s3478_s16 + $0x70] sm:$0xff] %v2234_v25   ;;  %v2584_v7 = vpop.f32.mrb[16].mxu1  ;;  %v2632_v28 = vpop.f32.mrb[16].mxu0  ;;  %s2929_s16 = sshll.u32 %s3085_s19, 4  ;;  %s2930_s16 = int_to_ptr.vmem [resolvable:$false] %s2929_s16 }
 0x1a5   : > { %v1066_v29 = vadd.f32 %v2632_v28, %v3523_v26  ;;  %v825_v30 = vpop.f32.mrb[17].mxu1  ;;  %v1057_v31 = vpop.f32.mrb[17].mxu0  ;;  %s2931_s20 = scalar_lea.vmem %s2930_s16, 4096  ;;  %p2932_p0 = scmp.lt.s32.totalorder %s3531_s24, %s2930_s16 }
 0x1a6   : > { %p2933_p2 = scmp.lt.s32.totalorder %s2931_s20, %s2925_s17 }
 0x1a8   : > { %p2934_p4 = por %p2933_p2, %p2932_p0 }
 0x1aa   : > { %p2935_p8 = pnand %p2934_p4, %p2928_p9 }
 0x1ac   : > { %2938 = shalt.err (!%p2935_p8)
}
 0x1ad   : > { %s2939_s25 = scalar_lea.hbm %s3529_s4, 2048  ;;  %s2943_s30 = scalar_lea.hbm %s3774_s7, 4096 }
 0x1ae   : > { %p2940_p12 = scmp.ne.s32.totalorder %s3529_s4, %s2939_s25  ;;  %p2944_p13 = scmp.lt.u32.totalorder %s3529_s4, %s3774_s7 }
 0x1af   : > { %p2945_p6 = scmp.lt.u32.totalorder %s2943_s30, %s2939_s25  ;;  %p2947_p5 = scmp.lt.u32.totalorder %s2939_s25, %s3529_s4 }
 0x1b0   : > { %p2941_p1 = pnand %p2940_p12, %p3298_p10 }
 0x1b1   : > { %p2946_p3 = por %p2945_p6, %p2944_p13 }
 0x1b2   : > { %p2942_p11 = pneg %p2941_p1 }
 0x1b3   : > { %p2948_p7 = por %p2947_p5, %p2946_p3 }
 0x1b5   : > { %p2949_p9 = pnand %p2948_p7, %p2942_p11 }
 0x1b7   : > { %2952 = shalt.err (!%p2949_p9)
}
 0x1b8   : > { %s3785_s17 = smov 64   ;;  %s3787_s19 = smov 4   ;;  %v2585_v32 = vpop.f32.mrb[18].mxu1  ;;  %v2633_v33 = vpop.f32.mrb[18].mxu0  ;;  %v834_v34 = vadd.f32 %v2584_v7, %v3540_v27  ;;  %v826_v39 = vadd.f32 %v3540_v27, %v825_v30  ;;  %v1058_v40 = vadd.f32 %v3523_v26, %v1057_v31 }
 0x1b9   : > { %2692 = dma.vmem_to_hbm [thread:$0]  (%p3298_p10), %s3531_s24, 2048, %s3529_s4, %s1665_s9, %s3785_s17, %s3785_s17, %s3787_s19   ;;  %v837_v35 = vadd.f32 %v2585_v32, %v3540_v27  ;;  %v1069_v36 = vadd.f32 %v2633_v33, %v3523_v26  ;;  %v828_v37 = vpop.f32.mrb[19].mxu1  ;;  %v1060_v38 = vpop.f32.mrb[19].mxu0 }
 0x1ba   : > { %v829_v41 = vadd.f32 %v3540_v27, %v828_v37  ;;  %v1061_v42 = vadd.f32 %v3523_v26, %v1060_v38  ;;  %s3578_s26 = scalar_lea.vmem [#allocation11], %s3468_s23  ;;  %s3582_s24 = scalar_lea.vmem [#allocation13], %s3468_s23  ;;  %v2588_v47 = vpop.f32.mrb[20].mxu1  ;;  %v2636_v48 = vpop.f32.mrb[20].mxu0 }
 0x1bb   : > { %v2249_v43 = vpack.c.bf16 %v837_v35, %v834_v34  ;;  %v2329_v44 = vpack.c.bf16 %v1069_v36, %v1066_v29  ;;  %v1082_v49 = vadd.f32 %v2636_v48, %v3523_v26  ;;  %v841_v50 = vpop.f32.mrb[21].mxu1  ;;  %v1073_v51 = vpop.f32.mrb[21].mxu0  ;;  %v850_v54 = vadd.f32 %v2588_v47, %v3540_v27  ;;  %s1669_s23 = sand.u32 1, %s3171_s15   ;;  %s1708_s4 = sshll.u32 %s3578_s26, 4  ;;  %s3676_s4 = int_to_ptr.vmem [resolvable:$true] %s1708_s4 }
 0x1bc   : > { %v2244_v45 = vpack.c.bf16 %v829_v41, %v826_v39  ;;  %v2324_v46 = vpack.c.bf16 %v1061_v42, %v1058_v40  ;;  %v2589_v52 = vpop.f32.mrb[22].mxu1  ;;  %v2637_v53 = vpop.f32.mrb[22].mxu0  ;;  %v842_v59 = vadd.f32 %v3540_v27, %v841_v50  ;;  %v1074_v60 = vadd.f32 %v3523_v26, %v1073_v51  ;;  %s1726_s15 = sshll.u32 %s3582_s24, 4  ;;  %s3811_s20 = sld [smem:[#allocation23_spill]]  ;;  %s3686_s15 = int_to_ptr.vmem [resolvable:$true] %s1726_s15 }
 0x1bd   : > { %2416 = vst [vmem:[%s3578_s26 + $0x8] sm:$0xff] %v2249_v43   ;;  %2431 = vst [vmem:[%s3582_s24 + $0x8] sm:$0xff] %v2329_v44   ;;  %v853_v55 = vadd.f32 %v2589_v52, %v3540_v27  ;;  %v1085_v56 = vadd.f32 %v2637_v53, %v3523_v26  ;;  %v844_v57 = vpop.f32.mrb[23].mxu1  ;;  %v1076_v58 = vpop.f32.mrb[23].mxu0  ;;  %s3812_s30 = sld [smem:[#allocation24_spill]]  ;;  %s3690_s17 = scalar_lea.sflag [#allocation12], %s1669_s23 }
 0x1be   : > { %2245 = vst [vmem:[%s3578_s26] sm:$0xff] %v2244_v45   ;;  %2325 = vst [vmem:[%s3582_s24] sm:$0xff] %v2324_v46   ;;  %v845_v61 = vadd.f32 %v3540_v27, %v844_v57  ;;  %v1077_v62 = vadd.f32 %v3523_v26, %v1076_v58  ;;  %v2592_v3 = vpop.f32.mrb[24].mxu1  ;;  %v2640_v4 = vpop.f32.mrb[24].mxu0  ;;  %s2953_s9 = scalar_lea.vmem %s3676_s4, 2048  ;;  %s3088_s16 = smov [#allocation11]  }
 0x1bf   : > { %v2259_v63 = vpack.c.bf16 %v853_v55, %v850_v54  ;;  %v2339_v0 = vpack.c.bf16 %v1085_v56, %v1082_v49  ;;  %v1098_v5 = vadd.f32 %v2640_v4, %v3523_v26  ;;  %v857_v6 = vpop.f32.mrb[25].mxu1  ;;  %v1089_v8 = vpop.f32.mrb[25].mxu0  ;;  %v866_v11 = vadd.f32 %v2592_v3, %v3540_v27  ;;  %p2954_p0 = scmp.ne.s32.totalorder %s3676_s4, %s2953_s9  ;;  %s2957_s19 = sshll.u32 %s3088_s16, 4  ;;  %s2958_s19 = int_to_ptr.vmem [resolvable:$false] %s2957_s19 }
 0x1c0   : > { %v2254_v1 = vpack.c.bf16 %v845_v61, %v842_v59  ;;  %v2334_v2 = vpack.c.bf16 %v1077_v62, %v1074_v60  ;;  %v2593_v9 = vpop.f32.mrb[26].mxu1  ;;  %v2641_v10 = vpop.f32.mrb[26].mxu0  ;;  %v858_v16 = vadd.f32 %v3540_v27, %v857_v6  ;;  %v1090_v17 = vadd.f32 %v3523_v26, %v1089_v8  ;;  %s2959_s0 = scalar_lea.vmem %s2958_s19, 4096  ;;  %p2960_p8 = scmp.lt.s32.totalorder %s3676_s4, %s2958_s19 }
 0x1c1   : > { %2418 = vst [vmem:[%s3578_s26 + $0x18] sm:$0xff] %v2259_v63   ;;  %2433 = vst [vmem:[%s3582_s24 + $0x18] sm:$0xff] %v2339_v0   ;;  %v869_v12 = vadd.f32 %v2593_v9, %v3540_v27  ;;  %v1101_v13 = vadd.f32 %v2641_v10, %v3523_v26  ;;  %v860_v14 = vpop.f32.mrb[27].mxu1  ;;  %v1092_v15 = vpop.f32.mrb[27].mxu0  ;;  %p2955_p2 = pnand %p2954_p0, %p3298_p10  ;;  %p2961_p12 = scmp.lt.s32.totalorder %s2959_s0, %s2953_s9 }
 0x1c2   : > { %2417 = vst [vmem:[%s3578_s26 + $0x10] sm:$0xff] %v2254_v1   ;;  %2432 = vst [vmem:[%s3582_s24 + $0x10] sm:$0xff] %v2334_v2   ;;  %v861_v18 = vadd.f32 %v3540_v27, %v860_v14  ;;  %v1093_v19 = vadd.f32 %v3523_v26, %v1092_v15  ;;  %v2596_v24 = vpop.f32.mrb[28].mxu1  ;;  %v2644_v25 = vpop.f32.mrb[28].mxu0  ;;  %s3674_s25 = scalar_lea.hbm %s3811_s20, %s3513_s21 }
 0x1c3   : > { %v2269_v20 = vpack.c.bf16 %v869_v12, %v866_v11  ;;  %v2349_v21 = vpack.c.bf16 %v1101_v13, %v1098_v5  ;;  %v1114_v7 = vadd.f32 %v2644_v25, %v3523_v26  ;;  %v873_v28 = vpop.f32.mrb[29].mxu1  ;;  %v1105_v29 = vpop.f32.mrb[29].mxu0  ;;  %v882_v32 = vadd.f32 %v2596_v24, %v3540_v27  ;;  %s3813_s27 = smov %s3812_s30  ;;  %s3684_s29 = scalar_lea.hbm %s3812_s30, %s3513_s21 }
 0x1c4   : > { %v2264_v22 = vpack.c.bf16 %v861_v18, %v858_v16  ;;  %v2344_v23 = vpack.c.bf16 %v1093_v19, %v1090_v17  ;;  %v2597_v30 = vpop.f32.mrb[30].mxu1  ;;  %v2645_v31 = vpop.f32.mrb[30].mxu0  ;;  %v874_v37 = vadd.f32 %v3540_v27, %v873_v28  ;;  %v1106_v38 = vadd.f32 %v3523_v26, %v1105_v29  ;;  %p2956_p4 = pneg %p2955_p2  ;;  %p2962_p1 = por %p2961_p12, %p2960_p8 }
 0x1c5   : > { %2420 = vst [vmem:[%s3578_s26 + $0x28] sm:$0xff] %v2269_v20   ;;  %2435 = vst [vmem:[%s3582_s24 + $0x28] sm:$0xff] %v2349_v21   ;;  %v885_v33 = vadd.f32 %v2597_v30, %v3540_v27  ;;  %v1117_v34 = vadd.f32 %v2645_v31, %v3523_v26  ;;  %v876_v35 = vpop.f32.mrb[31].mxu1  ;;  %v1108_v36 = vpop.f32.mrb[31].mxu0 }
 0x1c6   : > { %2419 = vst [vmem:[%s3578_s26 + $0x20] sm:$0xff] %v2264_v22   ;;  %2434 = vst [vmem:[%s3582_s24 + $0x20] sm:$0xff] %v2344_v23   ;;  %v877_v39 = vadd.f32 %v3540_v27, %v876_v35  ;;  %v1109_v40 = vadd.f32 %v3523_v26, %v1108_v36  ;;  %v2600_v45 = vpop.f32.mrb[32].mxu1  ;;  %v2648_v46 = vpop.f32.mrb[32].mxu0  ;;  %p2963_p11 = pnand %p2962_p1, %p2956_p4 }
 0x1c7   : > { %v2279_v41 = vpack.c.bf16 %v885_v33, %v882_v32  ;;  %v2359_v42 = vpack.c.bf16 %v1117_v34, %v1114_v7  ;;  %v1130_v47 = vadd.f32 %v2648_v46, %v3523_v26  ;;  %v889_v48 = vpop.f32.mrb[33].mxu1  ;;  %v1121_v49 = vpop.f32.mrb[33].mxu0  ;;  %v898_v52 = vadd.f32 %v2600_v45, %v3540_v27 }
 0x1c8   : > { %v2274_v43 = vpack.c.bf16 %v877_v39, %v874_v37  ;;  %v2354_v44 = vpack.c.bf16 %v1109_v40, %v1106_v38  ;;  %v2601_v50 = vpop.f32.mrb[34].mxu1  ;;  %v2649_v51 = vpop.f32.mrb[34].mxu0  ;;  %v890_v57 = vadd.f32 %v3540_v27, %v889_v48  ;;  %v1122_v58 = vadd.f32 %v3523_v26, %v1121_v49 }
 0x1c9   : > { %2422 = vst [vmem:[%s3578_s26 + $0x38] sm:$0xff] %v2279_v41   ;;  %2437 = vst [vmem:[%s3582_s24 + $0x38] sm:$0xff] %v2359_v42   ;;  %v901_v53 = vadd.f32 %v2601_v50, %v3540_v27  ;;  %v1133_v54 = vadd.f32 %v2649_v51, %v3523_v26  ;;  %v892_v55 = vpop.f32.mrb[35].mxu1  ;;  %v1124_v56 = vpop.f32.mrb[35].mxu0 }
 0x1ca   : > { %2421 = vst [vmem:[%s3578_s26 + $0x30] sm:$0xff] %v2274_v43   ;;  %2436 = vst [vmem:[%s3582_s24 + $0x30] sm:$0xff] %v2354_v44   ;;  %v893_v59 = vadd.f32 %v3540_v27, %v892_v55  ;;  %v1125_v60 = vadd.f32 %v3523_v26, %v1124_v56 }
 0x1cb   : > { %v2289_v61 = vpack.c.bf16 %v901_v53, %v898_v52  ;;  %v2369_v62 = vpack.c.bf16 %v1133_v54, %v1130_v47 }
 0x1cc   : > { %v2284_v63 = vpack.c.bf16 %v893_v59, %v890_v57  ;;  %v2364_v0 = vpack.c.bf16 %v1125_v60, %v1122_v58  ;;  %v2604_v1 = vpop.f32.mrb[36].mxu1  ;;  %v2652_v2 = vpop.f32.mrb[36].mxu0 }
 0x1cd   : > { %2424 = vst [vmem:[%s3578_s26 + $0x48] sm:$0xff] %v2289_v61   ;;  %2439 = vst [vmem:[%s3582_s24 + $0x48] sm:$0xff] %v2369_v62   ;;  %v1146_v3 = vadd.f32 %v2652_v2, %v3523_v26  ;;  %v905_v4 = vpop.f32.mrb[37].mxu1  ;;  %v1137_v5 = vpop.f32.mrb[37].mxu0  ;;  %v914_v9 = vadd.f32 %v2604_v1, %v3540_v27 }
 0x1ce   : > { %2423 = vst [vmem:[%s3578_s26 + $0x40] sm:$0xff] %v2284_v63   ;;  %2438 = vst [vmem:[%s3582_s24 + $0x40] sm:$0xff] %v2364_v0   ;;  %v2605_v6 = vpop.f32.mrb[38].mxu1  ;;  %v2653_v8 = vpop.f32.mrb[38].mxu0  ;;  %v906_v14 = vadd.f32 %v3540_v27, %v905_v4  ;;  %v1138_v15 = vadd.f32 %v3523_v26, %v1137_v5 }
 0x1cf   : > { %v917_v10 = vadd.f32 %v2605_v6, %v3540_v27  ;;  %v1149_v11 = vadd.f32 %v2653_v8, %v3523_v26  ;;  %v908_v12 = vpop.f32.mrb[39].mxu1  ;;  %v1140_v13 = vpop.f32.mrb[39].mxu0 }
 0x1d0   : > { %v909_v16 = vadd.f32 %v3540_v27, %v908_v12  ;;  %v1141_v17 = vadd.f32 %v3523_v26, %v1140_v13 }
 0x1d1   : > { %v2299_v18 = vpack.c.bf16 %v917_v10, %v914_v9  ;;  %v2379_v19 = vpack.c.bf16 %v1149_v11, %v1146_v3 }
 0x1d2   : > { %v2294_v20 = vpack.c.bf16 %v909_v16, %v906_v14  ;;  %v2374_v21 = vpack.c.bf16 %v1141_v17, %v1138_v15 }
 0x1d3   : > { %2426 = vst [vmem:[%s3578_s26 + $0x58] sm:$0xff] %v2299_v18   ;;  %2441 = vst [vmem:[%s3582_s24 + $0x58] sm:$0xff] %v2379_v19  }
 0x1d4   : > { %2425 = vst [vmem:[%s3578_s26 + $0x50] sm:$0xff] %v2294_v20   ;;  %2440 = vst [vmem:[%s3582_s24 + $0x50] sm:$0xff] %v2374_v21   ;;  %v2608_v22 = vpop.f32.mrb[40].mxu1  ;;  %v2656_v23 = vpop.f32.mrb[40].mxu0 }
 0x1d5   : > { %v1162_v24 = vadd.f32 %v2656_v23, %v3523_v26  ;;  %v921_v25 = vpop.f32.mrb[41].mxu1  ;;  %v1153_v7 = vpop.f32.mrb[41].mxu0  ;;  %v930_v30 = vadd.f32 %v2608_v22, %v3540_v27 }
 0x1d6   : > { %v2609_v28 = vpop.f32.mrb[42].mxu1  ;;  %v2657_v29 = vpop.f32.mrb[42].mxu0  ;;  %v922_v35 = vadd.f32 %v3540_v27, %v921_v25  ;;  %v1154_v36 = vadd.f32 %v3523_v26, %v1153_v7 }
 0x1d7   : > { %v933_v31 = vadd.f32 %v2609_v28, %v3540_v27  ;;  %v1165_v32 = vadd.f32 %v2657_v29, %v3523_v26  ;;  %v924_v33 = vpop.f32.mrb[43].mxu1  ;;  %v1156_v34 = vpop.f32.mrb[43].mxu0 }
 0x1d8   : > { %v925_v37 = vadd.f32 %v3540_v27, %v924_v33  ;;  %v1157_v38 = vadd.f32 %v3523_v26, %v1156_v34 }
 0x1d9   : > { %v2309_v39 = vpack.c.bf16 %v933_v31, %v930_v30  ;;  %v2389_v40 = vpack.c.bf16 %v1165_v32, %v1162_v24 }
 0x1da   : > { %v2304_v41 = vpack.c.bf16 %v925_v37, %v922_v35  ;;  %v2384_v42 = vpack.c.bf16 %v1157_v38, %v1154_v36 }
 0x1db   : > { %2428 = vst [vmem:[%s3578_s26 + $0x68] sm:$0xff] %v2309_v39   ;;  %2443 = vst [vmem:[%s3582_s24 + $0x68] sm:$0xff] %v2389_v40  }
 0x1dc   : > { %2427 = vst [vmem:[%s3578_s26 + $0x60] sm:$0xff] %v2304_v41   ;;  %2442 = vst [vmem:[%s3582_s24 + $0x60] sm:$0xff] %v2384_v42   ;;  %v2612_v43 = vpop.f32.mrb[44].mxu1  ;;  %v2660_v44 = vpop.f32.mrb[44].mxu0 }
 0x1dd   : > { %v1178_v45 = vadd.f32 %v2660_v44, %v3523_v26  ;;  %v937_v46 = vpop.f32.mrb[45].mxu1  ;;  %v1169_v47 = vpop.f32.mrb[45].mxu0  ;;  %v946_v50 = vadd.f32 %v2612_v43, %v3540_v27 }
 0x1de   : > { %v2613_v48 = vpop.f32.mrb[46].mxu1  ;;  %v2661_v49 = vpop.f32.mrb[46].mxu0  ;;  %v938_v55 = vadd.f32 %v3540_v27, %v937_v46  ;;  %v1170_v56 = vadd.f32 %v3523_v26, %v1169_v47 }
 0x1df   : > { %v949_v51 = vadd.f32 %v2613_v48, %v3540_v27  ;;  %v1181_v52 = vadd.f32 %v2661_v49, %v3523_v26  ;;  %v940_v53 = vpop.f32.mrb[47].mxu1  ;;  %v1172_v54 = vpop.f32.mrb[47].mxu0 }
 0x1e0   : > { %v941_v57 = vadd.f32 %v3540_v27, %v940_v53  ;;  %v1173_v58 = vadd.f32 %v3523_v26, %v1172_v54 }
 0x1e1   : > { %v2319_v59 = vpack.c.bf16 %v949_v51, %v946_v50  ;;  %v2399_v60 = vpack.c.bf16 %v1181_v52, %v1178_v45 }
 0x1e2   : > { %v2314_v61 = vpack.c.bf16 %v941_v57, %v938_v55  ;;  %v2394_v62 = vpack.c.bf16 %v1173_v58, %v1170_v56 }
 0x1e3   : > { %2430 = vst [vmem:[%s3578_s26 + $0x78] sm:$0xff] %v2319_v59   ;;  %2445 = vst [vmem:[%s3582_s24 + $0x78] sm:$0xff] %v2399_v60  }
 0x1e4   : > { %2429 = vst [vmem:[%s3578_s26 + $0x70] sm:$0xff] %v2314_v61   ;;  %2444 = vst [vmem:[%s3582_s24 + $0x70] sm:$0xff] %v2394_v62  }
 0x1e5   : > { %2966 = shalt.err (!%p2963_p11)
}
 0x1e6   : > { %s2967_s21 = scalar_lea.hbm %s3674_s25, 2048  ;;  %s2971_s23 = scalar_lea.hbm %s3811_s20, 4096 }
 0x1e7   : > { %p2968_p13 = scmp.ne.s32.totalorder %s3674_s25, %s2967_s21  ;;  %p2972_p5 = scmp.lt.u32.totalorder %s3674_s25, %s3811_s20 }
 0x1e8   : > { %p2973_p7 = scmp.lt.u32.totalorder %s2971_s23, %s2967_s21  ;;  %p2975_p0 = scmp.lt.u32.totalorder %s2967_s21, %s3674_s25 }
 0x1e9   : > { %p2969_p6 = pnand %p2968_p13, %p3298_p10 }
 0x1ea   : > { %p2974_p9 = por %p2973_p7, %p2972_p5 }
 0x1eb   : > { %p2970_p3 = pneg %p2969_p6 }
 0x1ec   : > { %p2976_p2 = por %p2975_p0, %p2974_p9 }
 0x1ee   : > { %p2977_p4 = pnand %p2976_p2, %p2970_p3 }
 0x1f0   : > { %2980 = shalt.err (!%p2977_p4)
}
 0x1f1   : > { %s3814_s0 = smov 4   ;;  %s3815_s18 = smov 64  }
 0x1f2   : > { %2693 = dma.vmem_to_hbm [thread:$0]  (%p3298_p10), %s3676_s4, 2048, %s3674_s25, %s3690_s17, %s3815_s18, %s3815_s18, %s3814_s0  }
 0x1f3   : > { %s2981_s30 = scalar_lea.vmem %s3686_s15, 2048  ;;  %s3089_s9 = smov [#allocation13]  }
 0x1f4   : > { %p2982_p8 = scmp.ne.s32.totalorder %s3686_s15, %s2981_s30  ;;  %s2985_s16 = sshll.u32 %s3089_s9, 4  ;;  %s2986_s16 = int_to_ptr.vmem [resolvable:$false] %s2985_s16 }
 0x1f5   : > { %s2987_s21 = scalar_lea.vmem %s2986_s16, 4096  ;;  %p2988_p11 = scmp.lt.s32.totalorder %s3686_s15, %s2986_s16 }
 0x1f6   : > { %p2983_p12 = pnand %p2982_p8, %p3298_p10  ;;  %p2989_p13 = scmp.lt.s32.totalorder %s2987_s21, %s2981_s30 }
 0x1f8   : > { %p2984_p1 = pneg %p2983_p12  ;;  %p2990_p6 = por %p2989_p13, %p2988_p11 }
 0x1fa   : > { %p2991_p3 = pnand %p2990_p6, %p2984_p1 }
 0x1fc   : > { %2994 = shalt.err (!%p2991_p3)
}
 0x1fd   : > { %s2995_s4 = scalar_lea.hbm %s3684_s29, 2048  ;;  %s2999_s24 = scalar_lea.hbm %s3813_s27, 4096 }
 0x1fe   : > { %p2996_p5 = scmp.ne.s32.totalorder %s3684_s29, %s2995_s4  ;;  %p3000_p0 = scmp.lt.u32.totalorder %s3684_s29, %s3813_s27 }
 0x1ff   : > { %p3001_p2 = scmp.lt.u32.totalorder %s2999_s24, %s2995_s4  ;;  %p3003_p8 = scmp.lt.u32.totalorder %s2995_s4, %s3684_s29 }
 0x200   : > { %p2997_p7 = pnand %p2996_p5, %p3298_p10 }
 0x201   : > { %p3002_p4 = por %p3001_p2, %p3000_p0 }
 0x202   : > { %p2998_p9 = pneg %p2997_p7 }
 0x203   : > { %p3004_p12 = por %p3003_p8, %p3002_p4 }
 0x205   : > { %p3005_p1 = pnand %p3004_p12, %p2998_p9 }
 0x207   : > { %3008 = shalt.err (!%p3005_p1)
}
 0x208   : > { %2694 = dma.vmem_to_hbm [thread:$0]  (%p3298_p10), %s3686_s15, 2048, %s3684_s29, %s3690_s17, %s3815_s18, %s3815_s18, %s3814_s0  }
 0x209 PF: > { %s3816_s19 = sld [smem:[#allocation19_spill]]  ;;  %s3817_s30 = sld [smem:[#allocation20_spill]] }
 0x20a   : > { %p3819_p13 = scmp.ge.s32.totalorder %s3075_s14, 2 }
 0x20f   : > { %s1741_s9 = sand.u32 1, %s3816_s19   ;;  %p3818_p11 = scmp.ne.s32.totalorder %s3817_s30, 0 }
 0x210   : > { %s1742_s16 = scalar_lea.sflag [#allocation4], %s1741_s9 }
 0x211   : > { %p2713_p6 = pnand %p3819_p13, %p3818_p11 }
 0x213   : > { %3046 = dma.done.wait (!%p2713_p6), %s1742_s16, 2048  }
 0x214   : > { %3048 = vsyncadd (!%p2713_p6), %s1742_s16, 4294965248  ;;  %s3820_s8 = sadd.s32 4294967294, %s3075_s14  }
 0x215   : > { %s1750_s21 = sand.u32 1, %s3820_s8  }
 0x216   : > { %s1751_s4 = scalar_lea.sflag [#allocation12], %s1750_s21 }
 0x217   : > { %3050 = dma.done.wait (!%p2713_p6), %s1751_s4, 4096  }
 0x218   : > { %3052 = vsyncadd (!%p2713_p6), %s1751_s4, 4294963200  ;;  %s31_s14 = sadd.s32 1, %s3075_s14   ;;  %s3821_s30 = smov %s3059_s10 }
 0x219   : > { %p28_p10 = scmp.ge.s32.totalorder %s31_s14, 4   ;;  %s3822_s10 = smov %s3063_s11 }
 0x21a   : > { %s3823_s11 = smov %s3310_s28  ;;  %s3824_s12 = smov %s3071_s13 }
 0x21b   : > { %s3825_s13 = smov %s3827_s22  ;;  %30 = sbr.rel (!%p28_p10) target bundleno = 15 (0xf), region = 137 }
 0x222   :  { %1765 = vsyncpa [#allocation3], 1 }
 0x223   :  { %1767 = vsyncpa [#allocation3 + $0x1], 1 }
 0x224   :  { %1768 = vsyncpa [#allocation6], 1 }
 0x225   :  { %1769 = vsyncpa [#allocation9], 1 }
 0x226   :  { %1770 = vsyncpa [#allocation4], 1 }
 0x227   :  { %1772 = vsyncpa [#allocation4 + $0x1], 1 }
 0x228   :  { %1773 = vsyncpa [#allocation12], 1 }
 0x229   :  { %1775 = vsyncpa [#allocation12 + $0x1], 1 }

</bundles_post_ra>
